<compile_context>
chip_gen: v6e
topology: v6e:2x2x1
jax: 0.10.0
libtpu: 0.0.40
codegen_flags: <defaults>
</compile_context>

<pallas_src>
import jax
import jax.numpy as jnp
import numpy as np
from jax.experimental import pallas as pl
from jax.experimental.pallas import tpu as pltpu


def _round_up(x, m):
    return ((x + m - 1) // m) * m


def _patch_embed_kernel(p_ref, w_ref, b_ref, o_ref):
    # (tile_m, Kp) bf16 @ (Kp, tile_n) bf16 -> f32 accumulate on the MXU, + f32 bias.
    acc = jnp.dot(p_ref[...], w_ref[...], preferred_element_type=jnp.float32)
    o_ref[...] = (acc + b_ref[...]).astype(o_ref.dtype)


def _pick_tile_m(m_rows):
    """m_rows is a multiple of 16.  Cap at 512 rows (already ~85% of the HBM
    roofline; bigger tiles only add padding waste and VMEM pressure); for
    small problems split into >=2 tiles so the 'parallel' grid axis can feed
    both v7x TensorCores."""
    tile = min(512, m_rows)
    if m_rows >= 32:
        tile = min(tile, _round_up((m_rows + 1) // 2, 16))
    return max(tile, 16)


def _pick_tile_n(n_cols):
    """n_cols is a multiple of 128.  Bound the resident weight block and the
    double-buffered output tile (v7x has only 64 MiB physical VMEM)."""
    if n_cols <= 512:
        return n_cols
    for cand in (512, 256, 128):
        if n_cols % cand == 0:
            return cand
    return 128


def patch_embed(x, weight, bias, kernel_size, stride=None, *,
                out_dtype=None, return_tokens=False):
    """Conv2d(C, E, kernel_size=K, stride=K) applied to NCHW input.

    x: (B, C, H, W); weight: (E, C, K, K); bias: (E,).
    Returns NCHW (B, E, H//K, W//K) by default (matches the PyTorch module),
    or tokens-major (B, (H//K)*(W//K), E) if return_tokens=True.
    """
    if stride is None:
        stride = kernel_size
    assert stride == kernel_size, "PatchEmbed kernel assumes kernel_size == stride"
    B, C, H, W = x.shape
    E, Cw, K, K2 = weight.shape
    assert Cw == C and K == kernel_size and K2 == kernel_size
    assert H % K == 0 and W % K == 0
    nH, nW = H // K, W // K
    M, Kdim, N = B * nH * nW, C * K * K, E
    out_dtype = x.dtype if out_dtype is None else out_dtype
    out_itemsize = jnp.dtype(out_dtype).itemsize

    # --- patchification (pure layout, plain JAX) -----------------------------
    # Cast to bf16 *before* the relayout: the transpose then moves half the
    # bytes and the MXU wants bf16 anyway.  Per-row order (C, kh, kw) matches
    # weight.reshape(E, C*K*K).
    xb = x.astype(jnp.bfloat16)
    patches = xb.reshape(B, C, nH, K, nW, K)
    patches = jnp.transpose(patches, (0, 2, 4, 1, 3, 5)).reshape(M, Kdim)
    w_mat = weight.reshape(E, Kdim).T.astype(jnp.bfloat16)          # (Kdim, E)

    # --- TPU-friendly shapes --------------------------------------------------
    Kp = _round_up(Kdim, 16)   # contraction dim: full-extent blocks are legal, so
                               # no 128-pad; 16 keeps bf16 sublane packing aligned.
    Np = _round_up(N, 128)     # output lanes (lane-dense, unmasked stores)
    M16 = _round_up(M, 16)     # bf16 LHS sublane packing
    tile_m = _pick_tile_m(M16)
    Mp = _round_up(M16, tile_m)
    tile_n = _pick_tile_n(Np)
    grid_m, grid_n = Mp // tile_m, Np // tile_n

    patches_p = jnp.pad(patches, ((0, Mp - M), (0, Kp - Kdim)))
    w_p = jnp.pad(w_mat, ((0, Kp - Kdim), (0, Np - N)))
    b_p = jnp.pad(bias.astype(jnp.float32), (0, Np - N)).reshape(1, Np)

    # VMEM actually used: double-buffered LHS / weight / bias / output tiles,
    # plus slack for Mosaic-internal scratch.  (Replaces the fixed 48 MiB.)
    vmem_need = (2 * tile_m * Kp * 2            # LHS tiles, bf16
                 + 2 * Kp * tile_n * 2          # weight block, bf16
                 + 2 * tile_n * 4               # bias, f32
                 + 2 * tile_m * tile_n * out_itemsize)
    vmem_limit = min(int(vmem_need * 1.5) + (8 << 20), 64 << 20)

    cost = pl.CostEstimate(
        flops=2 * Mp * Np * Kp,
        transcendentals=0,
        bytes_accessed=(Mp * Kp * 2 + grid_m * Kp * Np * 2 + Np * 4
                        + Mp * Np * out_itemsize),
    )

    out = pl.pallas_call(
        _patch_embed_kernel,
        out_shape=jax.ShapeDtypeStruct((Mp, Np), out_dtype),
        grid_spec=pltpu.PrefetchScalarGridSpec(
            num_scalar_prefetch=0,
            grid=(grid_m, grid_n),
            in_specs=[
                # LHS block index is constant along the inner n axis, so each
                # patch-row tile is read from HBM exactly once.
                pl.BlockSpec((tile_m, Kp), lambda i, j: (i, 0)),
                # Weight / bias: constant along m -> VMEM-resident per n block.
                pl.BlockSpec((Kp, tile_n), lambda i, j: (0, j)),
                pl.BlockSpec((1, tile_n), lambda i, j: (0, j)),
            ],
            out_specs=pl.BlockSpec((tile_m, tile_n), lambda i, j: (i, j)),
        ),
        compiler_params=pltpu.CompilerParams(
            dimension_semantics=("parallel", "parallel"),  # independent tiles -> 2 TCs on v7x
            vmem_limit_bytes=vmem_limit,
        ),
        cost_estimate=cost,
    )(patches_p, w_p, b_p)

    out = out[:M, :N]
    if return_tokens:
        # ViT consumers flatten to (B, tokens, E) anyway; skip the NCHW round-trip.
        return out.reshape(B, nH * nW, E)
    out = out.reshape(B, nH, nW, E)
    return jnp.transpose(out, (0, 3, 1, 2))


def _reference_conv(x, weight, bias, stride):
    # Pure-JAX reference (lax conv, f32) for correctness check.
    out = jax.lax.conv_general_dilated(
        x, weight,
        window_strides=(stride, stride),
        padding="VALID",
        dimension_numbers=("NCHW", "OIHW", "NCHW"),
    )
    return out + bias.reshape(1, -1, 1, 1)


if __name__ == "__main__":
    # Small, module-consistent shapes: in_channels=4, embed_dim=32, kernel=stride=4.
    B, C, H, W = 2, 4, 16, 16
    E, K = 32, 4

    key = jax.random.PRNGKey(0)
    kx, kw, kb = jax.random.split(key, 3)

    x = jax.random.normal(kx, (B, C, H, W), dtype=jnp.float32)
    fan_in = C * K * K
    bound = 1.0 / np.sqrt(fan_in)
    weight = jax.random.uniform(kw, (E, C, K, K), dtype=jnp.float32,
                                minval=-bound, maxval=bound)
    bias = jax.random.uniform(kb, (E,), dtype=jnp.float32,
                              minval=-bound, maxval=bound)

    out = patch_embed(x, weight, bias, kernel_size=K, stride=K)
    out = jax.block_until_ready(out)
    assert out.shape == (B, E, H // K, W // K)

    ref = jax.block_until_ready(_reference_conv(x, weight, bias, K))
    # bf16 MXU inputs (f32 accumulate) -> relax the f32 reference tolerance.
    np.testing.assert_allclose(np.asarray(out), np.asarray(ref), rtol=5e-2, atol=5e-2)

    # Tokens-major output path (skips the NCHW round-trip for ViT consumers).
    tok = jax.block_until_ready(
        patch_embed(x, weight, bias, kernel_size=K, stride=K, return_tokens=True))
    ref_tok = jnp.transpose(ref, (0, 2, 3, 1)).reshape(B, -1, E)
    np.testing.assert_allclose(np.asarray(tok), np.asarray(ref_tok),
                               rtol=5e-2, atol=5e-2)

    print("KERNEL_OK")
</pallas_src>

<mosaic_0001>
module attributes {stable_mosaic.version = 11 : i64} {
  func.func @_patch_embed_kernel(%arg0: i32, %arg1: i32, %arg2: memref<16x64xbf16, #tpu.memory_space<vmem>>, %arg3: memref<64x128xbf16, #tpu.memory_space<vmem>>, %arg4: memref<1x128xf32, #tpu.memory_space<vmem>>, %arg5: memref<16x128xf32, #tpu.memory_space<vmem>>) attributes {dimension_semantics = [#tpu.dimension_semantics<parallel>, #tpu.dimension_semantics<parallel>], iteration_bounds = array<i64: 2, 1>, scalar_prefetch = 0 : i64, scratch_operands = 0 : i64, tpu.core_type = #tpu.core_type<tc>, window_params = [{transform_indices = @transform_0, window_bounds = array<i64: 16, 64>}, {transform_indices = @transform_1, window_bounds = array<i64: 64, 128>}, {transform_indices = @transform_2, window_bounds = array<i64: 1, 128>}, {transform_indices = @transform_3, window_bounds = array<i64: 16, 128>}]} {
    %c0 = arith.constant 0 : index
    %c0_0 = arith.constant 0 : index
    %0 = vector.load %arg2[%c0, %c0_0] : memref<16x64xbf16, #tpu.memory_space<vmem>>, vector<16x64xbf16>
    %c0_1 = arith.constant 0 : index
    %c0_2 = arith.constant 0 : index
    %1 = vector.load %arg3[%c0_1, %c0_2] : memref<64x128xbf16, #tpu.memory_space<vmem>>, vector<64x128xbf16>
    %cst = arith.constant dense<0.000000e+00> : vector<16x128xf32>
    %2 = tpu.matmul %0, %1, %cst {dimension_numbers = #tpu.dot_dimension_numbers<[1], [0], [0], [1], [0, 0, 1, 1], [], []>} : vector<16x64xbf16>, vector<64x128xbf16>, vector<16x128xf32> -> vector<16x128xf32>
    %c0_3 = arith.constant 0 : index
    %c0_4 = arith.constant 0 : index
    %3 = vector.load %arg4[%c0_3, %c0_4] : memref<1x128xf32, #tpu.memory_space<vmem>>, vector<1x128xf32>
    %4 = vector.broadcast %3 : vector<1x128xf32> to vector<16x128xf32>
    %5 = arith.addf %2, %4 : vector<16x128xf32>
    %c0_5 = arith.constant 0 : index
    %c0_6 = arith.constant 0 : index
    %6 = vector.load %arg5[%c0_5, %c0_6] : memref<16x128xf32, #tpu.memory_space<vmem>>, vector<16x128xf32>
    tpu.vector_store %arg5[%c0_5, %c0_6], %5 {strides = array<i32>} : memref<16x128xf32, #tpu.memory_space<vmem>>, vector<16x128xf32>,
    return
  }
  func.func @transform_0(%arg0: i32, %arg1: i32) -> (i32, i32) {
    %c0_i32 = arith.constant 0 : i32
    %c0_i32_0 = arith.constant 0 : i32
    return %arg0, %c0_i32 : i32, i32
  }
  func.func @transform_1(%arg0: i32, %arg1: i32) -> (i32, i32) {
    %c0_i32 = arith.constant 0 : i32
    %c0_i32_0 = arith.constant 0 : i32
    return %c0_i32, %arg1 : i32, i32
  }
  func.func @transform_2(%arg0: i32, %arg1: i32) -> (i32, i32) {
    %c0_i32 = arith.constant 0 : i32
    %c0_i32_0 = arith.constant 0 : i32
    return %c0_i32, %arg1 : i32, i32
  }
  func.func @transform_3(%arg0: i32, %arg1: i32) -> (i32, i32) {
    %c0_i32 = arith.constant 0 : i32
    return %arg0, %arg1 : i32, i32
  }
}

</mosaic_0001>

<bundles_post_ra>
// kernel: tpu_custom_call.1
= control target key start
LH: loop header
LB: loop body
LE: loop exit
PB: predicated region body
PF: predicated region fallthrough
CT: control target
= control target key end

     0   :  { %8 = vsyncpa [#allocation3], 0  ;;  %s945_s0 = inlined_call_operand.hbm [shape: bf16[32,64], index: 0, kind: input, shape index: {}]   ;;  %s946_s1 = inlined_call_operand.hbm [shape: bf16[64,128], index: 1, kind: input, shape index: {}]   ;;  %s947_s2 = inlined_call_operand.vmem [shape: f32[1,128], index: 2, kind: input, shape index: {}]   ;;  %s948_s3 = inlined_call_operand.hbm [shape: f32[32,128], index: 3, kind: output, shape index: {}]  }
   0x1   :  { %10 = vsyncpa [#allocation3 + $0x1], 0 }
   0x2   :  { %11 = vsyncpa [#allocation6], 0 }
   0x3   :  { %12 = vsyncpa [#allocation4], 0 }
   0x4   :  { %14 = vsyncpa [#allocation4 + $0x1], 0  ;;  %s754_s12 = smov 0   ;;  %s756_s13 = smov 0  }
   0x5   :  { %s758_s14 = smov 0   ;;  %s760_s15 = smov 0  }
   0x6   :  { %s762_s16 = smov 0   ;;  %s764_s17 = smov 0  }
   0x7 LB: > { %s457_s18 = sadd.s32 4294967295, %s723_s17   ;;  %s458_s19 = sadd.s32 4294967294, %s723_s17   ;;  %s723_s17 = sphi %s764_s17, %s20_s17   ;;  %s719_s16 = sphi %s762_s16, %s970_s16   ;;  %s715_s15 = sphi %s760_s15, %s969_s15   ;;  %s711_s14 = sphi %s758_s14, %s968_s14   ;;  %s707_s13 = sphi %s756_s13, %s967_s13   ;;  %s703_s12 = sphi %s754_s12, %s966_s12  }
   0x8   : > { %p52_p0 = scmp.ne.s32.totalorder %s707_s13, %s703_s12  ;;  %p788_p1 = scmp.eq.s32.totalorder %s457_s18, 0 }
   0x9   : > { %p792_p2 = scmp.eq.s32.totalorder %s457_s18, 1  ;;  %p136_p3 = scmp.eq.s32.totalorder %s458_s19, 1 }
   0xa   : > { %p798_p4 = por %p788_p1, %p52_p0  ;;  %p459_p5 = scmp.ge.s32.totalorder %s723_s17, 1 }
   0xb   : > { %p803_p6 = por %p136_p3, %p52_p0  ;;  %p143_p7 = scmp.lt.s32.totalorder %s723_s17, 3 }
   0xc   : > { %s954_s22 = scalar_select %p798_p4, 1, 0 }
   0xd   : > { %s955_s23 = scalar_select %p803_p6, 1, 0 }
   0xe   : > { %p808_p8 = pnand %p459_p5, %p143_p7  ;;  %s725_s25 = smov [#allocation5]  }
   0xf   : > { %s157_s26 = sshll.u32 %s725_s25, 4  ;;  %s32_s28 = sadd.s32 1, %s719_s16  ;;  %s158_s26 = int_to_ptr.vmem [resolvable:$true] %s157_s26 }
  0x10   : > { %p509_p9 = pneg %p808_p8  ;;  %s596_s29 = scalar_lea.vmem %s158_s26, 512 }
  0x11   : > { %p597_p13 = scmp.ne.s32.totalorder %s158_s26, %s596_s29  ;;  %p604_p5 = scmp.lt.s32.totalorder %s158_s26, %s158_s26 }
  0x12   : > { %p817_p11 = pnand %p509_p9, %p788_p1  ;;  %p605_p7 = scmp.lt.s32.totalorder %s596_s29, %s596_s29 }
  0x14   : > { %p587_p12 = pneg %p817_p11  ;;  %p606_p6 = por %p605_p7, %p604_p5 }
  0x16   : > { %p599_p0 = pnand %p597_p13, %p587_p12 }
  0x18   : > { %p600_p3 = pneg %p599_p0 }
  0x1a   : > { %p607_p4 = pnand %p606_p6, %p600_p3 }
  0x1c   : > { %610 = shalt.err (!%p607_p4)
}
  0x1d   : > { %s950_s30 = smov 64   ;;  %s951_s4 = smov 4  }
  0x1e   : > { %512 = dma.hbm_to_vmem [thread:$0]  (!%p817_p11), %s946_s1, 512, %s158_s26, [#allocation6], %s950_s30, %s950_s30, %s951_s4  }
  0x1f   : > { %p34_p4 = scmp.ge.s32.totalorder %s32_s28, 2  ;;  %s39_s7 = sadd.s32 1, %s711_s14 }
  0x20   : > { %p46_p6 = scmp.ne.s32.totalorder %s711_s14, %s707_s13  ;;  %p47_p9 = scmp.eq.s32.totalorder %s723_s17, 0 }
  0x21   : > { %s972_s28 = smov (%p34_p4, %s32_s28), 0  ;;  %p522_p0 = scmp.lt.s32.totalorder %s723_s17, 2 }
  0x22   : > { %p838_p12 = por %p47_p9, %p46_p6  ;;  %p844_p13 = por %p792_p2, %p46_p6 }
  0x23   : > { %s36_s10 = ssub.s32 %s719_s16, %s972_s28  ;;  %s177_s11 = sand.u32 1, %s711_s14  }
  0x24   : > { %p37_p11 = scmp.eq.s32.totalorder %s36_s10, 0  ;;  %s463_s18 = sshll.u32 %s177_s11, 3 }
  0x25   : > { %s482_s25 = sshll.u32 %s719_s16, 7  ;;  %s181_s5 = scalar_lea.vmem [#allocation2], %s463_s18 }
  0x26   : > { %s853_s19 = scalar_select %p37_p11, %s711_s14, %s39_s7  }
  0x27   : > { %s187_s29 = scalar_lea.hbm %s945_s0, %s482_s25  ;;  %s188_s6 = sshll.u32 %s181_s5, 4  ;;  %s189_s6 = int_to_ptr.vmem [resolvable:$true] %s188_s6 }
  0x28   : > { %p861_p2 = pnand %p522_p0, %p838_p12  ;;  %s178_s30 = scalar_lea.sflag [#allocation3], %s177_s11 }
  0x29   : > { %s624_s10 = scalar_lea.vmem %s189_s6, 128  ;;  %s728_s7 = smov [#allocation2]  }
  0x2a   : > { %p613_p3 = pneg %p861_p2  ;;  %p625_p5 = scmp.ne.s32.totalorder %s189_s6, %s624_s10 }
  0x2b   : > { %s629_s4 = sshll.u32 %s728_s7, 4  ;;  %s630_s4 = int_to_ptr.vmem [resolvable:$false] %s629_s4 }
  0x2c   : > { %p627_p7 = pnand %p625_p5, %p613_p3  ;;  %s631_s25 = scalar_lea.vmem %s630_s4, 256 }
  0x2d   : > { %p632_p6 = scmp.lt.s32.totalorder %s189_s6, %s630_s4  ;;  %p633_p9 = scmp.lt.s32.totalorder %s631_s25, %s624_s10 }
  0x2e   : > { %p628_p4 = pneg %p627_p7 }
  0x2f   : > { %p634_p11 = por %p633_p9, %p632_p6 }
  0x31   : > { %p635_p10 = pnand %p634_p11, %p628_p4 }
  0x33   : > { %638 = shalt.err (!%p635_p10)
}
  0x34   : > { %s961_s8 = smov 4   ;;  %s962_s18 = smov 64  }
  0x35   : > { %516 = dma.hbm_to_vmem [thread:$0]  (!%p861_p2), %s187_s29, 128, %s189_s6, %s178_s30, %s962_s18, %s962_s18, %s961_s8  }
  0x36   : > { %200 = sbr.rel (%p808_p8) target bundleno = 292 (0x124), region = 32  ;;  %s875_s11 = sand.u32 (!%p808_p8), 1, %s707_s13  }
  0x37   : > { %s467_s4 = sshll.u32 (!%p808_p8), %s875_s11, 3  ;;  %s203_s26 = scalar_lea.sflag (!%p808_p8), [#allocation3], %s875_s11 }
  0x38   : > { %s206_s27 = scalar_lea.vmem (!%p808_p8), [#allocation2], %s467_s4  ;;  %p963_p12 = scmp.ne.s32.totalorder (!%p808_p8), %s954_s22, 0 }
  0x3b   : > { %690 = dma.done.wait (%p963_p12), %s203_s26, 128  }
  0x3c   : > { %692 = vsyncadd (%p963_p12), %s203_s26, 4294967168 }
  0x3d   : > { %694 = dma.done.wait (%p788_p1), [#allocation6], 512  }
  0x3e   : > { %696 = vsyncadd (%p788_p1), [#allocation6], 4294966784  ;;  %v729_v0 = vmov 0.0   ;;  %vm730_vm0 = vmmov 0   ;;  %v580_v1 = vld [vmem:[#allocation5 + $0x18] sm:$0xff]   ;;  %v581_v2 = vld [vmem:[#allocation5 + $0x10] sm:$0xff]  }
  0x3f   : > { %489 = vmatprep.subr.bf16.mxu0 %v729_v0  ;;  %497 = vmatprep.mubr.msk.bf16.mxu0 %vm730_vm0, %v729_v0  ;;  %v582_v3 = vld [vmem:[#allocation5 + $0x8] sm:$0xff]   ;;  %v583_v4 = vld [vmem:[#allocation5] sm:$0xff]   ;;  %v584_v5 = vld [vmem:[%s206_s27] sm:$0xff]   ;;  %vm288_vm1 = vcmask 523264   ;;  %s469_s20 = sshll.u32 %s875_s11, 4  ;;  %s483_s5 = sshll.u32 %s715_s15, 8 }
  0x40   : > { %490 = vmatpush3.bf16.msra.mxu0 %v580_v1  ;;  %v470_v6 = vld [vmem:[%s947_s2] ss:$0 sm:$0xff]  ;;  %s235_s30 = scalar_lea.vmem [#allocation7], %s469_s20  ;;  %s897_s10 = scalar_lea.hbm %s948_s3, %s483_s5 }
  0x41   : > { %491 = vmatprep.subr.bf16.mxu0 %v729_v0  ;;  %s350_s29 = sshll.u32 %s235_s30, 4  ;;  %s336_s7 = scalar_lea.sflag [#allocation4], %s875_s11  ;;  %s892_s29 = int_to_ptr.vmem [resolvable:$true] %s350_s29 }
  0x42   : > { %s639_s25 = scalar_lea.vmem %s892_s29, 256  ;;  %s731_s15 = smov [#allocation7]  }
  0x43   : > { %p640_p1 = scmp.ne.s32.totalorder %s892_s29, %s639_s25  ;;  %s643_s8 = sshll.u32 %s731_s15, 4  ;;  %s644_s8 = int_to_ptr.vmem [resolvable:$false] %s643_s8 }
  0x44   : > { %492 = vmatpush3.bf16.msra.mxu0 %v581_v2  ;;  %s645_s18 = scalar_lea.vmem %s644_s8, 512  ;;  %p646_p0 = scmp.lt.s32.totalorder %s892_s29, %s644_s8 }
  0x45   : > { %493 = vmatprep.subr.bf16.mxu0 %v729_v0  ;;  %p641_p8 = pnand %p640_p1, %p844_p13  ;;  %p647_p2 = scmp.lt.s32.totalorder %s645_s18, %s639_s25 }
  0x47   : > { %p642_p10 = pneg %p641_p8  ;;  %p648_p3 = por %p647_p2, %p646_p0 }
  0x48   : > { %494 = vmatpush3.bf16.msra.mxu0 %v582_v3 }
  0x49   : > { %495 = vmatprep.subr.bf16.mxu0 %v729_v0  ;;  %p649_p5 = pnand %p648_p3, %p642_p10 }
  0x4c   : > { %496 = vmatpush3.bf16.msra.mxu0 %v583_v4 }
  0x4f   : > { %498 = vmatmul.mubr.msk.bf16.vlgmr.msra.gmra.mxu0 %vm288_vm1, %v584_v5 }
 0x10f   : > { %v326_v7 = vpop.f32.mrf.mxu0 }
 0x110   : > { %v327_v8 = vadd.f32 %v470_v6, %v326_v7 }
 0x111   : > { %v499_v9 = vpop.f32.mrf.mxu0 }
 0x112   : > { %333 = vst [vmem:[%s235_s30] sm:$0xff] %v327_v8 }
 0x113   : > { %v329_v10 = vpop.f32.mrf.mxu0 }
 0x114   : > { %v330_v11 = vadd.f32 %v470_v6, %v329_v10 }
 0x115   : > { %v500_v12 = vpop.f32.mrf.mxu0 }
 0x116   : > { %334 = vst [vmem:[%s235_s30 + $0x8] sm:$0xff] %v330_v11 }
 0x117   : > { %652 = shalt.err (!%p649_p5)
}
 0x118   : > { %s653_s4 = scalar_lea.hbm %s897_s10, 256  ;;  %s657_s20 = scalar_lea.hbm %s948_s3, 512 }
 0x119   : > { %p654_p7 = scmp.ne.s32.totalorder %s897_s10, %s653_s4  ;;  %p658_p9 = scmp.lt.s32.totalorder %s897_s10, %s948_s3 }
 0x11a   : > { %p659_p11 = scmp.lt.s32.totalorder %s657_s20, %s653_s4 }
 0x11b   : > { %p655_p4 = pnand %p654_p7, %p844_p13 }
 0x11c   : > { %p660_p12 = por %p659_p11, %p658_p9 }
 0x11d   : > { %p656_p6 = pneg %p655_p4 }
 0x11f   : > { %p661_p1 = pnand %p660_p12, %p656_p6 }
 0x121   : > { %664 = shalt.err (!%p661_p1)
}
 0x122   : > { %s732_s30 = smov 128   ;;  %s733_s5 = smov 8  }
 0x123   : > { %507 = dma.vmem_to_hbm [thread:$0]  (%p844_p13), %s892_s29, 256, %s897_s10, %s336_s7, %s732_s30, %s732_s30, %s733_s5  }
 0x124 PF: > { %s365_s6 = sand.u32 1, %s703_s12   ;;  %p964_p8 = scmp.ne.s32.totalorder %s955_s23, 0 }
 0x125   : > { %p965_p10 = scmp.ge.s32.totalorder %s723_s17, 2  ;;  %s366_s21 = scalar_lea.sflag [#allocation4], %s365_s6 }
 0x127   : > { %p518_p0 = pnand %p965_p10, %p964_p8 }
 0x129   : > { %p519_p2 = pneg %p518_p0 }
 0x12b   : > { %698 = dma.done.wait (%p519_p2), %s366_s21, 256  }
 0x12c   : > { %700 = vsyncadd (%p519_p2), %s366_s21, 4294967040  ;;  %s20_s17 = sadd.s32 1, %s723_s17   ;;  %s966_s12 = smov %s707_s13 }
 0x12d   : > { %p17_p3 = scmp.ge.s32.totalorder %s20_s17, 4   ;;  %s967_s13 = smov %s711_s14 }
 0x12e   : > { %s968_s14 = smov %s853_s19  ;;  %s969_s15 = smov %s719_s16 }
 0x12f   : > { %s970_s16 = smov %s972_s28  ;;  %19 = sbr.rel (!%p17_p3) target bundleno = 7 (0x7), region = 85 }
 0x134   :  { %371 = vsyncpa [#allocation3], 1 }
 0x135   :  { %373 = vsyncpa [#allocation3 + $0x1], 1 }
 0x136   :  { %374 = vsyncpa [#allocation6], 1 }
 0x137   :  { %375 = vsyncpa [#allocation4], 1 }
 0x138   :  { %377 = vsyncpa [#allocation4 + $0x1], 1 }

</bundles_post_ra>
